<compile_context>
chip_gen: v6e
topology: v6e:2x2x1
jax: 0.10.0
libtpu: 0.0.40
codegen_flags: <defaults>
</compile_context>

<pallas_src>
import functools

import jax
import jax.numpy as jnp
from jax.experimental import pallas as pl
from jax.experimental.pallas import tpu as pltpu


def _round_up(a, m):
    return ((a + m - 1) // m) * m


def _embed_sum_kernel(ids_ref, table_ref, o_ref, *, col_offsets):
    # ids_ref:   (tile, C)    int32   C = P*F packed id columns
    # table_ref: (PV, Dout)   float32 (block-diagonal when P > 1)
    # o_ref:     (tile, Dout) float32
    ids = ids_ref[...]
    tile = ids.shape[0]
    pv = table_ref.shape[0]
    iota_v = jax.lax.broadcasted_iota(jnp.int32, (tile, pv), 1)
    onehot = jnp.zeros((tile, pv), jnp.float32)
    # C is small and static (<= 36) -> fully unrolled VPU compares/adds.
    for j, off in enumerate(col_offsets):
        onehot = onehot + (iota_v == (ids[:, j:j + 1] + off)).astype(jnp.float32)
    # Tiny-K matmul on the MXU; HIGHEST precision keeps the gather exact in f32.
    o_ref[...] = jnp.dot(
        onehot, table_ref[...],
        preferred_element_type=jnp.float32,
        precision=jax.lax.Precision.HIGHEST,
    ).astype(o_ref.dtype)


@functools.partial(jax.jit, static_argnames=("col_offsets", "tile_rows"))
def _embed_sum_pallas(ids, table, *, col_offsets, tile_rows):
    R, C = ids.shape
    PV, Dout = table.shape
    kernel = functools.partial(_embed_sum_kernel, col_offsets=col_offsets)
    return pl.pallas_call(
        kernel,
        out_shape=jax.ShapeDtypeStruct((R, Dout), jnp.float32),
        grid_spec=pltpu.PrefetchScalarGridSpec(
            num_scalar_prefetch=0,
            grid=(pl.cdiv(R, tile_rows),),          # ragged last block is masked
            in_specs=[
                pl.BlockSpec((tile_rows, C), lambda i: (i, 0)),   # node-id tile
                pl.BlockSpec((PV, Dout), lambda i: (0, 0)),       # table, resident
            ],
            out_specs=pl.BlockSpec((tile_rows, Dout), lambda i: (i, 0)),
        ),
        compiler_params=pltpu.CompilerParams(
            dimension_semantics=("parallel",),      # megacore / v7x 2-TC sharding
        ),
    )(ids, table)


# OGB atom feature vocabulary sizes (ogb.utils.features.get_atom_feature_dims()).
_ATOM_FEATURE_DIMS = (119, 4, 12, 12, 10, 6, 6, 2, 2)


class OGBNodeEncoderPallas:
    """JAX/Pallas analogue of OGB_NodeEncoder ('mol' -> AtomEncoder, 'ppa' -> Embedding(1, D))."""

    def __init__(self, ogb_dataset, embed_dim, key=None, tile_rows=2048):
        self.embed_dim = int(embed_dim)
        self.tile_rows = int(tile_rows)
        if "mol" in ogb_dataset:
            vocab_sizes = _ATOM_FEATURE_DIMS
        elif "ppa" in ogb_dataset:
            vocab_sizes = (1,)
        else:
            raise ValueError(f"unsupported ogb_dataset: {ogb_dataset}")
        self.vocab_sizes = tuple(int(v) for v in vocab_sizes)
        self.num_features = len(self.vocab_sizes)

        if key is None:
            key = jax.random.PRNGKey(0)

        # Per-feature tables concatenated along rows; feat_offsets[f] is the row
        # offset of feature f's sub-table in the combined table.
        offs, acc = [], 0
        for v in self.vocab_sizes:
            offs.append(acc)
            acc += v
        self.feat_offsets = tuple(offs)
        v_total = acc
        # TODO(synk): AtomEncoder uses xavier_uniform per-table init; a scaled
        # normal is used here (init scheme does not change the kernel).
        self.combined_table = 0.1 * jax.random.normal(
            key, (v_total, self.embed_dim), jnp.float32)

        # Sublane-align the vocab axis (zero rows are never selected).
        self.v_pad = _round_up(v_total, 8)
        self.table_padded = jnp.zeros(
            (self.v_pad, self.embed_dim), jnp.float32
        ).at[:v_total].set(self.combined_table)

        # Lane-dense packing: P nodes per 128-lane output row via a
        # block-diagonal table.  [N/P, P*D] row-major == [N, D] row-major.
        D = self.embed_dim
        self.pack = 128 // D if (D <= 128 and 128 % D == 0) else 1
        if self.pack > 1:
            P, Vp = self.pack, self.v_pad
            bd = jnp.zeros((P * Vp, P * D), jnp.float32)
            for p in range(P):
                bd = bd.at[p * Vp:(p + 1) * Vp, p * D:(p + 1) * D].set(self.table_padded)
            self.table_blockdiag = bd
            self.packed_offsets = tuple(
                p * Vp + o for p in range(P) for o in self.feat_offsets)

    def _tile(self, rows):
        # Big tiles (amortise per-step overhead), clamped to the array,
        # always a multiple of 8 sublanes.
        return min(_round_up(self.tile_rows, 8), _round_up(rows, 8))

    def __call__(self, x):
        x = jnp.asarray(x, jnp.int32)
        if x.ndim == 1:
            x = x[:, None]
        n, f = x.shape
        assert f == self.num_features
        P = self.pack
        if P > 1 and n % P == 0:
            # Packed, lane-dense path: [N, F] -> [N/P, P*F] (free reshape),
            # block-diagonal table -> output [N/P, P*D] == [N, D] bit-for-bit.
            ids = x.reshape(n // P, P * f)
            out = _embed_sum_pallas(
                ids, self.table_blockdiag,
                col_offsets=self.packed_offsets,
                tile_rows=self._tile(n // P))
            return out.reshape(n, self.embed_dim)
        # Unpacked fallback (used when N is not a multiple of the pack factor).
        return _embed_sum_pallas(
            x, self.table_padded,
            col_offsets=self.feat_offsets,
            tile_rows=self._tile(n))


def _reference_forward(enc, x):
    x = jnp.asarray(x, jnp.int32)
    if x.ndim == 1:
        x = x[:, None]
    y = jnp.zeros((x.shape[0], enc.embed_dim), jnp.float32)
    for f in range(enc.num_features):
        y = y + jnp.take(enc.combined_table, x[:, f] + enc.feat_offsets[f], axis=0)
    return y


if __name__ == "__main__":
    key = jax.random.PRNGKey(0)
    k_ppa, k_mol, k_idx = jax.random.split(key, 3)

    # --- 'ppa' path: nn.Embedding(1, embed_dim) on all-zero node indices. ---
    N, D = 64, 32
    x_ppa = jnp.zeros((N,), jnp.int32)
    enc_ppa = OGBNodeEncoderPallas("ogbg-ppa", embed_dim=D, key=k_ppa)
    y_ppa = jax.block_until_ready(enc_ppa(x_ppa))
    assert y_ppa.shape == (N, D)
    assert jnp.allclose(y_ppa, _reference_forward(enc_ppa, x_ppa), atol=1e-5, rtol=1e-5)

    # --- 'mol' path: AtomEncoder (sum of 9 per-feature embedding lookups). ---
    N_mol = 40
    enc_mol = OGBNodeEncoderPallas("ogbg-molhiv", embed_dim=D, key=k_mol)
    cols = [jax.random.randint(jax.random.fold_in(k_idx, f), (N_mol,), 0, v)
            for f, v in enumerate(enc_mol.vocab_sizes)]
    x_mol = jnp.stack(cols, axis=1).astype(jnp.int32)
    y_mol = jax.block_until_ready(enc_mol(x_mol))
    assert y_mol.shape == (N_mol, D)
    assert jnp.allclose(y_mol, _reference_forward(enc_mol, x_mol), atol=1e-5, rtol=1e-5)

    # --- ragged / unpacked fallback: N not a multiple of the pack factor. ---
    N_rag = 19
    x_rag = jnp.stack(
        [jax.random.randint(jax.random.fold_in(k_idx, 100 + f), (N_rag,), 0, v)
         for f, v in enumerate(enc_mol.vocab_sizes)], axis=1).astype(jnp.int32)
    y_rag = jax.block_until_ready(enc_mol(x_rag))
    assert y_rag.shape == (N_rag, D)
    assert jnp.allclose(y_rag, _reference_forward(enc_mol, x_rag), atol=1e-5, rtol=1e-5)

    print("KERNEL_OK")
</pallas_src>

<mosaic_0001>
module attributes {stable_mosaic.version = 11 : i64} {
  func.func @_embed_sum_kernel(%arg0: i32, %arg1: memref<16x4xi32, #tpu.memory_space<vmem>>, %arg2: memref<32x128xf32, #tpu.memory_space<vmem>>, %arg3: memref<16x128xf32, #tpu.memory_space<vmem>>) attributes {dimension_semantics = [#tpu.dimension_semantics<parallel>], iteration_bounds = array<i64: 1>, scalar_prefetch = 0 : i64, scratch_operands = 0 : i64, tpu.core_type = #tpu.core_type<tc>, window_params = [{transform_indices = @transform_0, window_bounds = array<i64: 16, 4>}, {pipeline_mode = #tpu.pipeline_mode<synchronous>, transform_indices = @transform_1, window_bounds = array<i64: 32, 128>}, {transform_indices = @transform_2, window_bounds = array<i64: 16, 128>}]} {
    %c0 = arith.constant 0 : index
    %c0_0 = arith.constant 0 : index
    %0 = vector.load %arg1[%c0, %c0_0] : memref<16x4xi32, #tpu.memory_space<vmem>>, vector<16x4xi32>
    %1 = tpu.iota {dimensions = array<i32: 1>} : vector<16x32xi32>
    %cst = arith.constant 0.000000e+00 : f32
    %2 = vector.broadcast %cst : f32 to vector<16x32xf32>
    %3 = vector.extract_strided_slice %0 {offsets = [0, 0], sizes = [16, 1], strides = [1, 1]} : vector<16x4xi32> to vector<16x1xi32>
    %c0_i32 = arith.constant 0 : i32
    %4 = vector.broadcast %c0_i32 : i32 to vector<16x1xi32>
    %5 = arith.addi %3, %4 : vector<16x1xi32>
    %6 = vector.broadcast %5 : vector<16x1xi32> to vector<16x32xi32>
    %7 = arith.cmpi eq, %1, %6 : vector<16x32xi32>
    %8 = arith.extui %7 : vector<16x32xi1> to vector<16x32xi32>
    %9 = arith.sitofp %8 : vector<16x32xi32> to vector<16x32xf32>
    %10 = arith.addf %2, %9 : vector<16x32xf32>
    %11 = vector.extract_strided_slice %0 {offsets = [0, 1], sizes = [16, 1], strides = [1, 1]} : vector<16x4xi32> to vector<16x1xi32>
    %c8_i32 = arith.constant 8 : i32
    %12 = vector.broadcast %c8_i32 : i32 to vector<16x1xi32>
    %13 = arith.addi %11, %12 : vector<16x1xi32>
    %14 = vector.broadcast %13 : vector<16x1xi32> to vector<16x32xi32>
    %15 = arith.cmpi eq, %1, %14 : vector<16x32xi32>
    %16 = arith.extui %15 : vector<16x32xi1> to vector<16x32xi32>
    %17 = arith.sitofp %16 : vector<16x32xi32> to vector<16x32xf32>
    %18 = arith.addf %10, %17 : vector<16x32xf32>
    %19 = vector.extract_strided_slice %0 {offsets = [0, 2], sizes = [16, 1], strides = [1, 1]} : vector<16x4xi32> to vector<16x1xi32>
    %c16_i32 = arith.constant 16 : i32
    %20 = vector.broadcast %c16_i32 : i32 to vector<16x1xi32>
    %21 = arith.addi %19, %20 : vector<16x1xi32>
    %22 = vector.broadcast %21 : vector<16x1xi32> to vector<16x32xi32>
    %23 = arith.cmpi eq, %1, %22 : vector<16x32xi32>
    %24 = arith.extui %23 : vector<16x32xi1> to vector<16x32xi32>
    %25 = arith.sitofp %24 : vector<16x32xi32> to vector<16x32xf32>
    %26 = arith.addf %18, %25 : vector<16x32xf32>
    %27 = vector.extract_strided_slice %0 {offsets = [0, 3], sizes = [16, 1], strides = [1, 1]} : vector<16x4xi32> to vector<16x1xi32>
    %c24_i32 = arith.constant 24 : i32
    %28 = vector.broadcast %c24_i32 : i32 to vector<16x1xi32>
    %29 = arith.addi %27, %28 : vector<16x1xi32>
    %30 = vector.broadcast %29 : vector<16x1xi32> to vector<16x32xi32>
    %31 = arith.cmpi eq, %1, %30 : vector<16x32xi32>
    %32 = arith.extui %31 : vector<16x32xi1> to vector<16x32xi32>
    %33 = arith.sitofp %32 : vector<16x32xi32> to vector<16x32xf32>
    %34 = arith.addf %26, %33 : vector<16x32xf32>
    %c0_1 = arith.constant 0 : index
    %c0_2 = arith.constant 0 : index
    %35 = vector.load %arg2[%c0_1, %c0_2] : memref<32x128xf32, #tpu.memory_space<vmem>>, vector<32x128xf32>
    %cst_3 = arith.constant dense<0.000000e+00> : vector<16x128xf32>
    %36 = tpu.matmul %34, %35, %cst_3 {dimension_numbers = #tpu.dot_dimension_numbers<[1], [0], [0], [1], [0, 0, 1, 1], [], []>, precision = #tpu.contract_precision<fp32>} : vector<16x32xf32>, vector<32x128xf32>, vector<16x128xf32> -> vector<16x128xf32>
    %c0_4 = arith.constant 0 : index
    %c0_5 = arith.constant 0 : index
    %37 = vector.load %arg3[%c0_4, %c0_5] : memref<16x128xf32, #tpu.memory_space<vmem>>, vector<16x128xf32>
    tpu.vector_store %arg3[%c0_4, %c0_5], %36 {strides = array<i32>} : memref<16x128xf32, #tpu.memory_space<vmem>>, vector<16x128xf32>,
    return
  }
  func.func @transform_0(%arg0: i32) -> (i32, i32) {
    %c0_i32 = arith.constant 0 : i32
    %c0_i32_0 = arith.constant 0 : i32
    return %arg0, %c0_i32 : i32, i32
  }
  func.func @transform_1(%arg0: i32) -> (i32, i32) {
    %c0_i32 = arith.constant 0 : i32
    %c0_i32_0 = arith.constant 0 : i32
    %c0_i32_1 = arith.constant 0 : i32
    return %c0_i32, %c0_i32_0 : i32, i32
  }
  func.func @transform_2(%arg0: i32) -> (i32, i32) {
    %c0_i32 = arith.constant 0 : i32
    %c0_i32_0 = arith.constant 0 : i32
    return %arg0, %c0_i32 : i32, i32
  }
}

</mosaic_0001>

<bundles_post_ra>
// kernel: _embed_sum_pallas.1
= control target key start
LH: loop header
LB: loop body
LE: loop exit
PB: predicated region body
PF: predicated region fallthrough
CT: control target
= control target key end

     0   :  { %7 = vsyncpa [#allocation3], 0  ;;  %s943_s0 = inlined_call_operand.vmem [shape: s32[16,4], index: 0, kind: input, shape index: {}]   ;;  %s944_s1 = inlined_call_operand.hbm [shape: f32[32,128], index: 1, kind: input, shape index: {}]   ;;  %s945_s2 = inlined_call_operand.hbm [shape: f32[16,128], index: 2, kind: output, shape index: {}]  }
   0x1   :  { %8 = vsyncpa [#allocation4], 0  ;;  %s821_s9 = smov [#allocation2]  }
   0x2   :  { %s16_s10 = sshll.u32 %s821_s9, 4  ;;  %s17_s10 = int_to_ptr.vmem [resolvable:$true] %s16_s10 }
   0x3   :  { %s785_s11 = scalar_lea.vmem %s17_s10, 512  ;;  %p790_p1 = scmp.lt.s32.totalorder %s17_s10, %s17_s10 }
   0x4   :  { %p786_p0 = scmp.ne.s32.totalorder %s17_s10, %s785_s11  ;;  %p791_p2 = scmp.lt.s32.totalorder %s785_s11, %s785_s11 }
   0x6   :  { %p792_p3 = por %p791_p2, %p790_p1 }
   0x8   :  { %p793_p4 = pnand %p792_p3, %p786_p0 }
   0xa   :  { %796 = shalt.err (!%p793_p4)
}
   0xb   :  { %s822_s12 = smov 128   ;;  %s823_s13 = smov 8  }
   0xc   :  { %22 = dma.hbm_to_vmem [thread:$0]  %s944_s1, 512, %s17_s10, [#allocation3], %s822_s12, %s822_s12, %s823_s13  }
   0xd   :  { %817 = dma.done.wait [#allocation3], 512  }
   0xe   :  { %818 = vsyncadd [#allocation3], 4294966784  ;;  %v824_v0 = vmov 0   ;;  %v27_v1 = vld [vmem:[%s943_s0 + $0x8] sm:$0xff]  ;;  %v26_v2 = vld [vmem:[%s943_s0] sm:$0xff]  ;;  %v825_v7 = vmov 1   ;;  %v28_v36 = vlaneseq }
   0xf   :  { %770 = vset.pattern.permute.xlu1 %v824_v0  ;;  %769 = vset.pattern.permute.xlu0 %v824_v0  ;;  %v45_v3 = vadd.s32 8, %v27_v1  ;;  %v44_v4 = vadd.s32 8, %v26_v2  ;;  %v95_v5 = vld [vmem:[#allocation2 + $0x18] sm:$0xff]  ;;  %v94_v8 = vld [vmem:[#allocation2 + $0x10] sm:$0xff]  ;;  %v60_v11 = vadd.s32 16, %v26_v2  ;;  %v61_v12 = vadd.s32 16, %v27_v1 }
  0x10   :  { %34 = vperm.xlu1 %770, %v27_v1   ;;  %31 = vperm.xlu0 %769, %v26_v2   ;;  %v857_v6 = vand.u32 4294901760, %v95_v5  ;;  %v862_v10 = vand.u32 4294901760, %v94_v8  ;;  %v93_v13 = vld [vmem:[#allocation2 + $0x8] sm:$0xff]  ;;  %v92_v17 = vld [vmem:[#allocation2] sm:$0xff]  ;;  %v826_v18 = vmov 2   ;;  %v76_v23 = vadd.s32 24, %v26_v2 }
  0x11   :  { %v871_v16 = vand.u32 4294901760, %v93_v13  ;;  %v883_v22 = vand.u32 4294901760, %v92_v17  ;;  %v827_v31 = vmov 3   ;;  %v77_v32 = vadd.s32 24, %v27_v1  ;;  %s829_s0 = smov [#allocation5]  }
  0x12   :  { %v860_v9 = vsub.f32 %v95_v5, %v857_v6  ;;  %694 = vmatprep.subr.mxu0 %v857_v6  ;;  %v869_v15 = vsub.f32 %v94_v8, %v862_v10  ;;  %v29_v39 = vand.u32 127, %v28_v36  ;;  %v828_v42 = vmov 0.0   ;;  %s638_s1 = sshll.u32 %s829_s0, 4  ;;  %s639_s1 = int_to_ptr.vmem [resolvable:$true] %s638_s1 }
  0x13   :  { %695 = vmatpush3.msra.mxu0 %v857_v6  ;;  %v881_v21 = vsub.f32 %v93_v13, %v871_v16  ;;  %v891_v27 = vsub.f32 %v92_v17, %v883_v22  ;;  %vm96_vm7 = vcmask 261120   ;;  %s797_s20 = scalar_lea.vmem %s639_s1, 256  ;;  %p802_p6 = scmp.lt.s32.totalorder %s639_s1, %s639_s1 }
  0x14   :  { %772 = vset.pattern.permute.xlu1 %v825_v7  ;;  %771 = vset.pattern.permute.xlu0 %v825_v7  ;;  %v866_v14 = vand.u32 4294901760, %v860_v9  ;;  %v878_v20 = vand.u32 4294901760, %v869_v15  ;;  %p798_p5 = scmp.ne.s32.totalorder %s639_s1, %s797_s20  ;;  %p803_p7 = scmp.lt.s32.totalorder %s797_s20, %s797_s20 }
  0x15   :  { %50 = vperm.xlu1 %772, %v45_v3   ;;  %47 = vperm.xlu0 %771, %v44_v4   ;;  %v888_v26 = vand.u32 4294901760, %v881_v21  ;;  %v898_v30 = vand.u32 4294901760, %v891_v27 }
  0x16   :  { %696 = vmatprep.subr.mxu0 %v862_v10  ;;  %v220_v19 = vsub.f32 %v860_v9, %v866_v14  ;;  %v227_v25 = vsub.f32 %v869_v15, %v878_v20  ;;  %p804_p8 = por %p803_p7, %p802_p6 }
  0x17   :  { %697 = vmatpush3.msra.mxu0 %v862_v10  ;;  %v234_v29 = vsub.f32 %v881_v21, %v888_v26  ;;  %v241_v34 = vsub.f32 %v891_v27, %v898_v30 }
  0x18   :  { %v221_v24 = vand.u32 4294901760, %v220_v19  ;;  %698 = vmatprep.subr.mxu0 %v871_v16  ;;  %v228_v28 = vand.u32 4294901760, %v227_v25  ;;  %p805_p9 = pnand %p804_p8, %p798_p5 }
  0x19   :  { %773 = vset.pattern.permute.xlu1 %v826_v18  ;;  %774 = vset.pattern.permute.xlu0 %v826_v18  ;;  %v235_v33 = vand.u32 4294901760, %v234_v29  ;;  %v242_v35 = vand.u32 4294901760, %v241_v34 }
  0x1a   :  { %63 = vperm.xlu1 %773, %v60_v11   ;;  %66 = vperm.xlu0 %774, %v61_v12  }
  0x1b   :  { %705 = vmatprep.subr.mxu1 %v221_v24  ;;  %699 = vmatpush3.msra.mxu0 %v871_v16 }
  0x1c   :  { %706 = vmatpush3.msra.mxu1 %v221_v24  ;;  %700 = vmatprep.subr.mxu0 %v883_v22 }
  0x1d   :  { %707 = vmatprep.subr.mxu1 %v228_v28  ;;  %701 = vmatpush3.msra.mxu0 %v883_v22 }
  0x1e   :  { %775 = vset.pattern.permute.xlu1 %v827_v31  ;;  %708 = vmatpush3.msra.mxu1 %v228_v28 }
  0x1f   :  { %79 = vperm.xlu1 %775, %v76_v23   ;;  %709 = vmatprep.subr.mxu1 %v235_v33 }
  0x20   :  { %710 = vmatpush3.msra.mxu1 %v235_v33  ;;  %716 = vmatprep.subr.mxu0 %v860_v9 }
  0x21   :  { %711 = vmatprep.subr.mxu1 %v242_v35  ;;  %776 = vset.pattern.permute.xlu0 %v827_v31 }
  0x22   :  { %712 = vmatpush3.msra.mxu1 %v242_v35 }
  0x23   :  { %82 = vperm.xlu1 %775, %v77_v32   ;;  %727 = vmatprep.subr.mxu1 %v857_v6 }
  0x8b   :  { %v35_v37 = vpop.permute.xlu1 %34  ;;  %v32_v38 = vpop.permute.xlu0 %31 }
  0x8c   :  { %vm36_vm0 = vcmp.eq.s32.totalorder %v29_v39, %v32_v38  ;;  %vm37_vm4 = vcmp.eq.s32.totalorder %v29_v39, %v35_v37 }
  0x8d   :  { %v650_v43 = vsel %vm36_vm0, 1.0, %v828_v42  ;;  %v651_v52 = vsel %vm37_vm4, 1.0, %v828_v42 }
  0x90   :  { %v51_v40 = vpop.permute.xlu1 %50  ;;  %v48_v41 = vpop.permute.xlu0 %47 }
  0x91   :  { %vm52_vm1 = vcmp.eq.s32.totalorder %v29_v39, %v48_v41  ;;  %vm53_vm3 = vcmp.eq.s32.totalorder %v29_v39, %v51_v40 }
  0x92   :  { %v652_v44 = vsel %vm52_vm1, 1.0, %v828_v42  ;;  %v653_v49 = vsel %vm53_vm3, 1.0, %v828_v42 }
  0x93   :  { %v58_v47 = vadd.f32 %v652_v44, %v650_v43  ;;  %v59_v55 = vadd.f32 %v653_v49, %v651_v52 }
  0x95   :  { %v64_v45 = vpop.permute.xlu1 %63  ;;  %v67_v46 = vpop.permute.xlu0 %66 }
  0x96   :  { %vm68_vm2 = vcmp.eq.s32.totalorder %v29_v39, %v64_v45  ;;  %vm69_vm5 = vcmp.eq.s32.totalorder %v29_v39, %v67_v46 }
  0x97   :  { %v654_v48 = vsel %vm68_vm2, 1.0, %v828_v42  ;;  %v655_v53 = vsel %vm69_vm5, 1.0, %v828_v42 }
  0x98   :  { %v74_v51 = vadd.f32 %v654_v48, %v58_v47  ;;  %v75_v58 = vadd.f32 %v655_v53, %v59_v55 }
  0x9a   :  { %v80_v50 = vpop.permute.xlu1 %79 }
  0x9b   :  { %vm84_vm6 = vcmp.eq.s32.totalorder %v29_v39, %v80_v50 }
  0x9c   :  { %v656_v54 = vsel %vm84_vm6, 1.0, %v828_v42 }
  0x9d   :  { %v90_v56 = vadd.f32 %v656_v54, %v74_v51 }
  0x9e   :  { %v83_v57 = vpop.permute.xlu1 %82 }
  0x9f   :  { %v98_v59 = vsel %vm96_vm7, %v90_v56, 0  ;;  %vm85_vm8 = vcmp.eq.s32.totalorder %v29_v39, %v83_v57 }
  0xa0   :  { %v172_v60 = vand.u32 4294901760, %v98_v59  ;;  %v657_v61 = vsel %vm85_vm8, 1.0, %v828_v42 }
  0xa1   :  { %v91_v62 = vadd.f32 %v657_v61, %v75_v58 }
  0xa2   :  { %v173_v63 = vsub.f32 %v98_v59, %v172_v60  ;;  %713 = vmatprep.mubr.f32.mxu1 %v172_v60 }
  0xa3   :  { %v101_v0 = vsel %vm96_vm7, %v91_v62, 0 }
  0xa4   :  { %v182_v1 = vand.u32 4294901760, %v101_v0  ;;  %v174_v2 = vand.u32 4294901760, %v173_v63 }
  0xa6   :  { %v183_v3 = vsub.f32 %v101_v0, %v182_v1  ;;  %714 = vmatmul.mubr.f32.vlgmr.msra.gmra.mxu1 %v182_v1  ;;  %v175_v4 = vsub.f32 %v173_v63, %v174_v2 }
  0xa7   :  { %728 = vmatpush3.msra.mxu1 %v857_v6  ;;  %735 = vmatprep.mubr.f32.mxu1 %v174_v2 }
  0xa8   :  { %729 = vmatprep.subr.mxu1 %v862_v10  ;;  %v176_v5 = vand.u32 4294901760, %v175_v4  ;;  %v184_v7 = vand.u32 4294901760, %v183_v3 }
  0xa9   :  { %730 = vmatpush3.msra.mxu1 %v862_v10 }
  0xaa   :  { %731 = vmatprep.subr.mxu1 %v871_v16  ;;  %702 = vmatprep.mubr.f32.mxu0 %v176_v5  ;;  %v185_v8 = vsub.f32 %v183_v3, %v184_v7 }
  0xab   :  { %732 = vmatpush3.msra.mxu1 %v871_v16 }
  0xac   :  { %733 = vmatprep.subr.mxu1 %v883_v22  ;;  %v186_v11 = vand.u32 4294901760, %v185_v8 }
  0xad   :  { %734 = vmatpush3.msra.mxu1 %v883_v22 }
  0xae   :  { %736 = vmatmul.mubr.f32.vlgmr.msra.gmra.mxu1 %v184_v7  ;;  %749 = vmatprep.subr.mxu1 %v857_v6 }
  0xaf   :  { %703 = vmatmul.mubr.f32.vlgmr.msra.gmra.mxu0 %v186_v11  ;;  %750 = vmatpush3.msra.mxu1 %v857_v6 }
  0xb0   :  { %717 = vmatpush3.msra.mxu0 %v860_v9  ;;  %757 = vmatprep.mubr.f32.mxu1 %v172_v60 }
  0xb1   :  { %718 = vmatprep.subr.mxu0 %v869_v15  ;;  %724 = vmatprep.mubr.f32.mxu0 %v173_v63 }
  0xb2   :  { %751 = vmatprep.subr.mxu1 %v862_v10  ;;  %719 = vmatpush3.msra.mxu0 %v869_v15 }
  0xb3   :  { %752 = vmatpush3.msra.mxu1 %v862_v10  ;;  %720 = vmatprep.subr.mxu0 %v881_v21 }
  0xb4   :  { %753 = vmatprep.subr.mxu1 %v871_v16  ;;  %721 = vmatpush3.msra.mxu0 %v881_v21 }
  0xb5   :  { %754 = vmatpush3.msra.mxu1 %v871_v16  ;;  %722 = vmatprep.subr.mxu0 %v891_v27 }
  0xb6   :  { %755 = vmatprep.subr.mxu1 %v883_v22  ;;  %723 = vmatpush3.msra.mxu0 %v891_v27 }
  0xb7   :  { %756 = vmatpush3.msra.mxu1 %v883_v22  ;;  %725 = vmatmul.mubr.f32.vlgmr.msra.gmra.mxu0 %v183_v3 }
  0xb8   :  { %738 = vmatprep.subr.mxu0 %v866_v14  ;;  %758 = vmatmul.mubr.f32.vlgmr.msra.gmra.mxu1 %v182_v1 }
  0xb9   :  { %739 = vmatpush3.msra.mxu0 %v866_v14  ;;  %746 = vmatprep.mubr.f32.mxu0 %v172_v60 }
  0xba   :  { %740 = vmatprep.subr.mxu0 %v878_v20 }
  0xbb   :  { %741 = vmatpush3.msra.mxu0 %v878_v20 }
  0xbc   :  { %742 = vmatprep.subr.mxu0 %v888_v26 }
  0xbd   :  { %743 = vmatpush3.msra.mxu0 %v888_v26 }
  0xbe   :  { %744 = vmatprep.subr.mxu0 %v898_v30 }
  0xbf   :  { %745 = vmatpush3.msra.mxu0 %v898_v30 }
  0xc0   :  { %747 = vmatmul.mubr.f32.vlgmr.msra.gmra.mxu0 %v182_v1 }
 0x166   :  { %v715_v9 = vpop.f32.mrf.mxu1 }
 0x168   :  { %v279_v13 = vpop.f32.mrf.mxu1 }
 0x16e   :  { %v737_v15 = vpop.f32.mrf.mxu1 }
 0x16f   :  { %v704_v6 = vpop.f32.mrf.mxu0 }
 0x170   :  { %v286_v14 = vadd.f32 %v715_v9, %v704_v6  ;;  %v449_v20 = vpop.f32.mrf.mxu1 }
 0x171   :  { %v178_v10 = vpop.f32.mrf.mxu0 }
 0x172   :  { %v280_v17 = vadd.f32 %v279_v13, %v178_v10 }
 0x177   :  { %v726_v12 = vpop.f32.mrf.mxu0 }
 0x178   :  { %v373_v18 = vadd.f32 %v726_v12, %v286_v14  ;;  %v759_v22 = vpop.f32.mrf.mxu1 }
 0x179   :  { %v365_v16 = vpop.f32.mrf.mxu0 }
 0x17a   :  { %v366_v19 = vadd.f32 %v365_v16, %v280_v17  ;;  %v458_v21 = vadd.f32 %v737_v15, %v373_v18  ;;  %v621_v29 = vpop.f32.mrf.mxu1 }
 0x17c   :  { %v450_v25 = vadd.f32 %v449_v20, %v366_v19 }
 0x180   :  { %v748_v23 = vpop.f32.mrf.mxu0 }
 0x181   :  { %v547_v24 = vadd.f32 %v748_v23, %v458_v21 }
 0x182   :  { %v540_v26 = vpop.f32.mrf.mxu0 }
 0x183   :  { %v628_v27 = vadd.f32 %v759_v22, %v547_v24  ;;  %v541_v28 = vadd.f32 %v540_v26, %v450_v25 }
 0x185   :  { %632 = vst [vmem:[#allocation5 + $0x8] sm:$0xff] %v628_v27  ;;  %v622_v30 = vadd.f32 %v621_v29, %v541_v28 }
 0x187   :  { %631 = vst [vmem:[#allocation5] sm:$0xff] %v622_v30 }
 0x188   :  { %808 = shalt.err (!%p805_p9)
}
 0x189   :  { %644 = dma.vmem_to_hbm [thread:$0]  %s639_s1, 256, %s945_s2, [#allocation4], %s822_s12, %s822_s12, %s823_s13  }
 0x18a   :  { %819 = dma.done.wait [#allocation4], 256  }
 0x18b   :  { %820 = vsyncadd [#allocation4], 4294967040 }
 0x18c   :  { %648 = vsyncpa [#allocation3], 1 }
 0x18d   :  { %649 = vsyncpa [#allocation4], 1 }

</bundles_post_ra>
